<compile_context>
chip_gen: v6e
topology: v6e:2x2x1
jax: 0.10.0
libtpu: 0.0.40
codegen_flags: <defaults>
</compile_context>

<pallas_src>
import jax
import jax.numpy as jnp
from jax.experimental import pallas as pl
from jax.experimental.pallas import tpu as pltpu


def dqn_kernel(x_ref, w1_ref, b1_ref, w2_ref, b2_ref, o_ref):
    x = x_ref[...]        # (tb, 3) f32
    w1 = w1_ref[...]      # (3, 256) f32
    # Hidden layer: K=3 contraction as 3 broadcast-FMAs on the VPU (skips the
    # MXU round-trip a (tb,3)@(3,256) matmul would serialize on).
    h = (x[:, 0:1] * w1[0:1, :]
         + x[:, 1:2] * w1[1:2, :]
         + x[:, 2:3] * w1[2:3, :])
    h = jnp.maximum(h + b1_ref[...], 0.0)                      # bias + ReLU in f32
    # Output layer: bf16 x bf16 on the MXU with f32 accumulation.
    out = jnp.dot(h.astype(jnp.bfloat16), w2_ref[...],
                  preferred_element_type=jnp.float32)
    o_ref[...] = (out + b2_ref[...]).astype(o_ref.dtype)


def _round_up(x, m):
    return ((x + m - 1) // m) * m


def prepare_params(w1, b1, w2, b2):
    """One-time parameter prep (hoisted out of the per-step forward):
    layer-2 weight cast to MXU-native bf16, biases shaped (1, N), layer-1
    kept f32 for the VPU FMAs."""
    return (w1.astype(jnp.float32),
            b1.reshape(1, -1).astype(jnp.float32),
            w2.astype(jnp.bfloat16),
            b2.reshape(1, -1).astype(jnp.float32))


def dqn_forward(state, params):
    w1, b1, w2, b2 = params
    B, in_dim = state.shape
    assert B >= 1, "dqn_forward requires a non-empty batch"
    hidden = w1.shape[1]
    num_actions = w2.shape[1]

    # Batch tiling: pad B to a multiple of 8 (sublane), then split into
    # ~1024-row tiles.  Total padding waste is <= ~8 rows per tile.
    TARGET_TB = 1024
    b8 = _round_up(B, 8)
    n_tiles = pl.cdiv(b8, TARGET_TB)
    tb = _round_up(pl.cdiv(b8, n_tiles), 8)
    b_pad = n_tiles * tb

    state_p = state if b_pad == B else jnp.pad(state, ((0, b_pad - B), (0, 0)))

    flops = 2 * b_pad * (in_dim * hidden + hidden * num_actions)
    bytes_accessed = (4 * state_p.size + 4 * w1.size + 4 * b1.size
                      + 2 * w2.size + 4 * b2.size + 4 * b_pad * num_actions)

    out = pl.pallas_call(
        dqn_kernel,
        out_shape=jax.ShapeDtypeStruct((b_pad, num_actions), jnp.float32),
        grid=(n_tiles,),
        in_specs=[
            pl.BlockSpec((tb, in_dim), lambda i: (i, 0)),   # state: tiled over batch
            pl.BlockSpec(w1.shape, lambda i: (0, 0)),       # weights: VMEM-resident
            pl.BlockSpec(b1.shape, lambda i: (0, 0)),
            pl.BlockSpec(w2.shape, lambda i: (0, 0)),
            pl.BlockSpec(b2.shape, lambda i: (0, 0)),
        ],
        out_specs=pl.BlockSpec((tb, num_actions), lambda i: (i, 0)),
        compiler_params=pltpu.CompilerParams(
            dimension_semantics=("parallel",),              # shards tiles across TCs on v7x
        ),
        cost_estimate=pl.CostEstimate(
            flops=flops, transcendentals=0, bytes_accessed=bytes_accessed),
    )(state_p, w1, b1, w2, b2)

    return out[:B]


def init_params(key, num_actions):
    """Deterministic init mimicking torch.nn.Linear defaults:
    U(-1/sqrt(fan_in), 1/sqrt(fan_in)) for both weight and bias."""
    k1, k2, k3, k4 = jax.random.split(key, 4)
    bound1 = 1.0 / jnp.sqrt(3.0)
    w1 = jax.random.uniform(k1, (3, 256), jnp.float32, -bound1, bound1)
    b1 = jax.random.uniform(k2, (256,), jnp.float32, -bound1, bound1)
    bound2 = 1.0 / jnp.sqrt(256.0)
    w2 = jax.random.uniform(k3, (256, num_actions), jnp.float32, -bound2, bound2)
    b2 = jax.random.uniform(k4, (num_actions,), jnp.float32, -bound2, bound2)
    return w1, b1, w2, b2


def dqn_reference_f32(state, w1, b1, w2, b2):
    h = jnp.maximum(state @ w1 + b1[None, :], 0.0)
    return h @ w2 + b2[None, :]


def dqn_reference_mixed(state, params):
    """Same dtype policy as the kernel (bf16 layer-2, f32 accum)."""
    w1, b1, w2_bf16, b2 = params
    h = jnp.maximum(state @ w1 + b1, 0.0)
    return jnp.dot(h.astype(jnp.bfloat16), w2_bf16,
                   preferred_element_type=jnp.float32) + b2


if __name__ == "__main__":
    num_actions = 4
    batch = 8

    key = jax.random.PRNGKey(0)
    k_params, k_state = jax.random.split(key)
    w1, b1, w2, b2 = init_params(k_params, num_actions)
    params = prepare_params(w1, b1, w2, b2)          # hoisted, one-time prep
    state = jax.random.normal(k_state, (batch, 3), jnp.float32)

    out = dqn_forward(state, params)
    out = jax.block_until_ready(out)

    assert out.shape == (batch, num_actions)
    # Tight check against a reference using the identical dtype policy.
    ref_mixed = dqn_reference_mixed(state, params)
    assert jnp.allclose(out, ref_mixed, atol=1e-3, rtol=1e-3)
    # Loose sanity check against the pure-f32 PyTorch-equivalent forward.
    ref_f32 = dqn_reference_f32(state, w1, b1, w2, b2)
    assert jnp.allclose(out, ref_f32, atol=5e-2, rtol=5e-2)

    print("KERNEL_OK")
</pallas_src>

<mosaic_0001>
module attributes {stable_mosaic.version = 11 : i64} {
  func.func @dqn_kernel(%arg0: i32, %arg1: memref<8x3xf32, #tpu.memory_space<vmem>>, %arg2: memref<3x256xf32, #tpu.memory_space<vmem>>, %arg3: memref<1x256xf32, #tpu.memory_space<vmem>>, %arg4: memref<256x4xbf16, #tpu.memory_space<vmem>>, %arg5: memref<1x4xf32, #tpu.memory_space<vmem>>, %arg6: memref<8x4xf32, #tpu.memory_space<vmem>>) attributes {dimension_semantics = [#tpu.dimension_semantics<parallel>], iteration_bounds = array<i64: 1>, scalar_prefetch = 0 : i64, scratch_operands = 0 : i64, tpu.core_type = #tpu.core_type<tc>, window_params = [{transform_indices = @transform_0, window_bounds = array<i64: 8, 3>}, {pipeline_mode = #tpu.pipeline_mode<synchronous>, transform_indices = @transform_1, window_bounds = array<i64: 3, 256>}, {pipeline_mode = #tpu.pipeline_mode<synchronous>, transform_indices = @transform_2, window_bounds = array<i64: 1, 256>}, {pipeline_mode = #tpu.pipeline_mode<synchronous>, transform_indices = @transform_3, window_bounds = array<i64: 256, 4>}, {pipeline_mode = #tpu.pipeline_mode<synchronous>, transform_indices = @transform_4, window_bounds = array<i64: 1, 4>}, {transform_indices = @transform_5, window_bounds = array<i64: 8, 4>}]} {
    %c0 = arith.constant 0 : index
    %c0_0 = arith.constant 0 : index
    %0 = vector.load %arg1[%c0, %c0_0] : memref<8x3xf32, #tpu.memory_space<vmem>>, vector<8x3xf32>
    %c0_1 = arith.constant 0 : index
    %c0_2 = arith.constant 0 : index
    %1 = vector.load %arg2[%c0_1, %c0_2] : memref<3x256xf32, #tpu.memory_space<vmem>>, vector<3x256xf32>
    %2 = vector.extract_strided_slice %0 {offsets = [0, 0], sizes = [8, 1], strides = [1, 1]} : vector<8x3xf32> to vector<8x1xf32>
    %3 = vector.extract_strided_slice %1 {offsets = [0, 0], sizes = [1, 256], strides = [1, 1]} : vector<3x256xf32> to vector<1x256xf32>
    %4 = vector.broadcast %2 : vector<8x1xf32> to vector<8x256xf32>
    %5 = vector.broadcast %3 : vector<1x256xf32> to vector<8x256xf32>
    %6 = arith.mulf %4, %5 : vector<8x256xf32>
    %7 = vector.extract_strided_slice %0 {offsets = [0, 1], sizes = [8, 1], strides = [1, 1]} : vector<8x3xf32> to vector<8x1xf32>
    %8 = vector.extract_strided_slice %1 {offsets = [1, 0], sizes = [1, 256], strides = [1, 1]} : vector<3x256xf32> to vector<1x256xf32>
    %9 = vector.broadcast %7 : vector<8x1xf32> to vector<8x256xf32>
    %10 = vector.broadcast %8 : vector<1x256xf32> to vector<8x256xf32>
    %11 = arith.mulf %9, %10 : vector<8x256xf32>
    %12 = arith.addf %6, %11 : vector<8x256xf32>
    %13 = vector.extract_strided_slice %0 {offsets = [0, 2], sizes = [8, 1], strides = [1, 1]} : vector<8x3xf32> to vector<8x1xf32>
    %14 = vector.extract_strided_slice %1 {offsets = [2, 0], sizes = [1, 256], strides = [1, 1]} : vector<3x256xf32> to vector<1x256xf32>
    %15 = vector.broadcast %13 : vector<8x1xf32> to vector<8x256xf32>
    %16 = vector.broadcast %14 : vector<1x256xf32> to vector<8x256xf32>
    %17 = arith.mulf %15, %16 : vector<8x256xf32>
    %18 = arith.addf %12, %17 : vector<8x256xf32>
    %c0_3 = arith.constant 0 : index
    %c0_4 = arith.constant 0 : index
    %19 = vector.load %arg3[%c0_3, %c0_4] : memref<1x256xf32, #tpu.memory_space<vmem>>, vector<1x256xf32>
    %20 = vector.broadcast %19 : vector<1x256xf32> to vector<8x256xf32>
    %21 = arith.addf %18, %20 : vector<8x256xf32>
    %cst = arith.constant 0.000000e+00 : f32
    %22 = vector.broadcast %cst : f32 to vector<8x256xf32>
    %23 = arith.maximumf %21, %22 : vector<8x256xf32>
    %24 = arith.truncf %23 : vector<8x256xf32> to vector<8x256xbf16>
    %c0_5 = arith.constant 0 : index
    %c0_6 = arith.constant 0 : index
    %25 = vector.load %arg4[%c0_5, %c0_6] : memref<256x4xbf16, #tpu.memory_space<vmem>>, vector<256x4xbf16>
    %cst_7 = arith.constant dense<0.000000e+00> : vector<8x4xf32>
    %26 = tpu.matmul %24, %25, %cst_7 {dimension_numbers = #tpu.dot_dimension_numbers<[1], [0], [0], [1], [0, 0, 1, 1], [], []>} : vector<8x256xbf16>, vector<256x4xbf16>, vector<8x4xf32> -> vector<8x4xf32>
    %c0_8 = arith.constant 0 : index
    %c0_9 = arith.constant 0 : index
    %27 = vector.load %arg5[%c0_8, %c0_9] : memref<1x4xf32, #tpu.memory_space<vmem>>, vector<1x4xf32>
    %28 = vector.broadcast %27 : vector<1x4xf32> to vector<8x4xf32>
    %29 = arith.addf %26, %28 : vector<8x4xf32>
    %c0_10 = arith.constant 0 : index
    %c0_11 = arith.constant 0 : index
    %30 = vector.load %arg6[%c0_10, %c0_11] : memref<8x4xf32, #tpu.memory_space<vmem>>, vector<8x4xf32>
    tpu.vector_store %arg6[%c0_10, %c0_11], %29 {strides = array<i32>} : memref<8x4xf32, #tpu.memory_space<vmem>>, vector<8x4xf32>,
    return
  }
  func.func @transform_0(%arg0: i32) -> (i32, i32) {
    %c0_i32 = arith.constant 0 : i32
    %c0_i32_0 = arith.constant 0 : i32
    return %arg0, %c0_i32 : i32, i32
  }
  func.func @transform_1(%arg0: i32) -> (i32, i32) {
    %c0_i32 = arith.constant 0 : i32
    %c0_i32_0 = arith.constant 0 : i32
    %c0_i32_1 = arith.constant 0 : i32
    return %c0_i32, %c0_i32_0 : i32, i32
  }
  func.func @transform_2(%arg0: i32) -> (i32, i32) {
    %c0_i32 = arith.constant 0 : i32
    %c0_i32_0 = arith.constant 0 : i32
    %c0_i32_1 = arith.constant 0 : i32
    return %c0_i32, %c0_i32_0 : i32, i32
  }
  func.func @transform_3(%arg0: i32) -> (i32, i32) {
    %c0_i32 = arith.constant 0 : i32
    %c0_i32_0 = arith.constant 0 : i32
    %c0_i32_1 = arith.constant 0 : i32
    return %c0_i32, %c0_i32_0 : i32, i32
  }
  func.func @transform_4(%arg0: i32) -> (i32, i32) {
    %c0_i32 = arith.constant 0 : i32
    %c0_i32_0 = arith.constant 0 : i32
    %c0_i32_1 = arith.constant 0 : i32
    return %c0_i32, %c0_i32_0 : i32, i32
  }
  func.func @transform_5(%arg0: i32) -> (i32, i32) {
    %c0_i32 = arith.constant 0 : i32
    %c0_i32_0 = arith.constant 0 : i32
    return %arg0, %c0_i32 : i32, i32
  }
}

</mosaic_0001>

<bundles_post_ra>
// kernel: tpu_custom_call.1
= control target key start
LH: loop header
LB: loop body
LE: loop exit
PB: predicated region body
PF: predicated region fallthrough
CT: control target
= control target key end

     0   :  { %v362_v0 = vmov 0   ;;  %v363_v2 = vmov 2   ;;  %v364_v7 = vmov 1   ;;  %v29_v20 = vlaneseq  ;;  %s458_s0 = inlined_call_operand.vmem [shape: f32[8,3], index: 0, kind: input, shape index: {}]   ;;  %s459_s3 = inlined_call_operand.vmem [shape: bf16[256,4], index: 3, kind: input, shape index: {}]   ;;  %s460_s1 = inlined_call_operand.vmem [shape: f32[3,256], index: 1, kind: input, shape index: {}]   ;;  %s461_s2 = inlined_call_operand.vmem [shape: f32[1,256], index: 2, kind: input, shape index: {}]   ;;  %s462_s4 = inlined_call_operand.vmem [shape: f32[1,4], index: 4, kind: input, shape index: {}]   ;;  %s463_s5 = inlined_call_operand.vmem [shape: f32[8,4], index: 5, kind: output, shape index: {}]  }
   0x1   :  { %342 = vset.pattern.permute.xlu0 %v362_v0  ;;  %v21_v1 = vld [vmem:[%s458_s0] sm:$0xff]  ;;  %344 = vset.pattern.permute.xlu1 %v363_v2  ;;  %v346_v3 = vld [vmem:[%s459_s3 + $0x78] sm:$0xff]   ;;  %v348_v5 = vld [vmem:[%s459_s3 + $0x70] sm:$0xff]   ;;  %vm294_vm0 = vcmask 31744  }
   0x2   :  { %25 = vperm.xlu0 %342, %v21_v1   ;;  %76 = vperm.xlu1 %344, %v21_v1   ;;  %v347_v4 = vld [vmem:[%s459_s3 + $0x38] sm:$0xff]   ;;  %v349_v6 = vld [vmem:[%s459_s3 + $0x30] sm:$0xff]   ;;  %v350_v8 = vld [vmem:[%s459_s3 + $0x68] sm:$0xff]   ;;  %v30_v21 = vshrl.u32 %v29_v20, 7 }
   0x3   :  { %317 = vmatprep.subr.bf16.mxu0 %v346_v3  ;;  %v351_v9 = vld [vmem:[%s459_s3 + $0x28] sm:$0xff]   ;;  %v352_v10 = vld [vmem:[%s459_s3 + $0x60] sm:$0xff]   ;;  %v354_v12 = vld [vmem:[%s459_s3 + $0x58] sm:$0xff]  }
   0x4   :  { %318 = vmatpush3.bf16.msra.mxu0 %v347_v4  ;;  %v353_v11 = vld [vmem:[%s459_s3 + $0x20] sm:$0xff]   ;;  %v355_v13 = vld [vmem:[%s459_s3 + $0x18] sm:$0xff]   ;;  %v356_v14 = vld [vmem:[%s459_s3 + $0x50] sm:$0xff]   ;;  %v31_v22 = vsub.s32 0, %v30_v21  ;;  %v35_v23 = vsub.s32 4, %v30_v21  ;;  %v55_v25 = vsub.s32 1, %v30_v21 }
   0x5   :  { %319 = vmatprep.subr.bf16.mxu0 %v348_v5  ;;  %v357_v15 = vld [vmem:[%s459_s3 + $0x10] sm:$0xff]   ;;  %v358_v16 = vld [vmem:[%s459_s3 + $0x48] sm:$0xff]   ;;  %v360_v18 = vld [vmem:[%s459_s3 + $0x40] sm:$0xff]   ;;  %v59_v26 = vsub.s32 5, %v30_v21  ;;  %v81_v27 = vsub.s32 2, %v30_v21  ;;  %v85_v28 = vsub.s32 6, %v30_v21 }
   0x6   :  { %343 = vset.pattern.permute.xlu0 %v364_v7  ;;  %v359_v17 = vld [vmem:[%s459_s3 + $0x8] sm:$0xff]   ;;  %v361_v19 = vld [vmem:[%s459_s3] sm:$0xff]  }
   0x7   :  { %50 = vperm.xlu0 %343, %v21_v1   ;;  %v22_v24 = vld [vmem:[%s460_s1] sm:$0x77] }
   0x8   :  { %320 = vmatpush3.bf16.msra.mxu0 %v349_v6  ;;  %v32_v29 = vrot.slane %v22_v24, %v31_v22  ;;  %v36_v30 = vrot.slane %v22_v24, %v35_v23  ;;  %v56_v31 = vrot.slane %v22_v24, %v55_v25  ;;  %v60_v32 = vrot.slane %v22_v24, %v59_v26  ;;  %v101_v46 = vld [vmem:[%s461_s2] sm:$0x3] }
   0x9   :  { %321 = vmatprep.subr.bf16.mxu0 %v350_v8  ;;  %v82_v33 = vrot.slane %v22_v24, %v81_v27  ;;  %v86_v34 = vrot.slane %v22_v24, %v85_v28  ;;  %v106_v53 = vrot.slane %v101_v46, %v31_v22  ;;  %v110_v54 = vrot.slane %v101_v46, %v55_v25  ;;  %v300_v0 = vld [vmem:[%s462_s4] ss:$0 sm:$0xff] }
   0xa   :  { %v42_v36 = vrot.slane %v32_v29, %v31_v22  ;;  %v46_v37 = vrot.slane %v36_v30, %v31_v22  ;;  %v66_v38 = vrot.slane %v56_v31, %v55_v25  ;;  %v70_v39 = vrot.slane %v60_v32, %v55_v25 }
   0xb   :  { %345 = vset.pattern.permute.xlu0 %v363_v2  ;;  %v92_v40 = vrot.slane %v82_v33, %v81_v27  ;;  %v96_v41 = vrot.slane %v86_v34, %v81_v27 }
   0xc   :  { %322 = vmatpush3.bf16.msra.mxu0 %v351_v9 }
   0xd   :  { %323 = vmatprep.subr.bf16.mxu0 %v352_v10 }
  0x10   :  { %324 = vmatpush3.bf16.msra.mxu0 %v353_v11 }
  0x11   :  { %325 = vmatprep.subr.bf16.mxu0 %v354_v12 }
  0x14   :  { %326 = vmatpush3.bf16.msra.mxu0 %v355_v13 }
  0x15   :  { %327 = vmatprep.subr.bf16.mxu0 %v356_v14 }
  0x18   :  { %328 = vmatpush3.bf16.msra.mxu0 %v357_v15 }
  0x19   :  { %329 = vmatprep.subr.bf16.mxu0 %v358_v16 }
  0x1c   :  { %330 = vmatpush3.bf16.msra.mxu0 %v359_v17 }
  0x1d   :  { %331 = vmatprep.subr.bf16.mxu0 %v360_v18 }
  0x20   :  { %332 = vmatpush3.bf16.msra.mxu0 %v361_v19 }
  0x7d   :  { %v26_v35 = vpop.permute.xlu0 %25  ;;  %v77_v42 = vpop.permute.xlu1 %76 }
  0x7e   :  { %v47_v43 = vmul.f32 %v42_v36, %v26_v35  ;;  %v48_v44 = vmul.f32 %v46_v37, %v26_v35  ;;  %v97_v49 = vmul.f32 %v92_v40, %v77_v42  ;;  %v98_v50 = vmul.f32 %v96_v41, %v77_v42 }
  0x82   :  { %v51_v45 = vpop.permute.xlu0 %50 }
  0x83   :  { %v71_v47 = vmul.f32 %v66_v38, %v51_v45  ;;  %v72_v48 = vmul.f32 %v70_v39, %v51_v45 }
  0x85   :  { %v73_v51 = vadd.f32 %v71_v47, %v47_v43  ;;  %v74_v52 = vadd.f32 %v72_v48, %v48_v44 }
  0x87   :  { %v99_v55 = vadd.f32 %v97_v49, %v73_v51  ;;  %v100_v56 = vadd.f32 %v98_v50, %v74_v52 }
  0x89   :  { %v114_v57 = vadd.f32 %v110_v54, %v100_v56  ;;  %v113_v58 = vadd.f32 %v106_v53, %v99_v55 }
  0x8b   :  { %v116_v59 = vmax.f32 %v114_v57, 0.0  ;;  %v115_v60 = vmax.f32 %v113_v58, 0.0 }
  0x8d   :  { %v118_v61 = vpack.c.bf16 %v116_v59, %v116_v59  ;;  %v117_v62 = vpack.c.bf16 %v115_v60, %v115_v60 }
  0x8f   :  { %286 = vmatprep.mubr.bf16.mxu0 %v118_v61 }
  0x90   :  { %287 = vmatmul.mubr.bf16.vlgmr.msra.gmra.mxu0 %v117_v62 }
 0x150   :  { %v333_v63 = vpop.f32.mrf.mxu0 }
 0x152   :  { %v334_v1 = vpop.f32.mrf.mxu0 }
 0x153   :  { %v335_v2 = vadd.f32 %v334_v1, %v333_v63 }
 0x154   :  { %v336_v3 = vpop.f32.mrf.mxu0 }
 0x155   :  { %v289_v4 = vadd.f32 %v335_v2, %v300_v0 }
 0x156   :  { %v337_v5 = vpop.f32.mrf.mxu0 }
 0x157   :  { %295 = vst.msk [vmem:[%s463_s5] sm:$0xff] %vm294_vm0, %v289_v4 }

</bundles_post_ra>
